<compile_context>
chip_gen: v7x
topology: tpu7x:2x2x1
jax: 0.10.0
libtpu: 0.0.40
codegen_flags: <defaults>
</compile_context>

<pallas_src>
import functools

import jax
import jax.numpy as jnp
import numpy as np
from jax.experimental import pallas as pl
from jax.experimental.pallas import tpu as pltpu


def _round_up(n, m):
    return ((n + m - 1) // m) * m


def _slab_width(hidden_dim, output_dim):
    # Packed per-step slab: [h (H) | c (H) | out (output_dim) | zero pad]
    return max(128, _round_up(2 * hidden_dim + output_dim, 128))


def _lstm_seq_kernel(x_ref, h0c0_ref, wg_ref, wout_ref, slab_ref, state_ref,
                     *, hidden_dim, output_dim):
    """One grid step = one LSTM time step + Linear head, all VMEM-resident.

    Hot path per step: in-register concats (XLU), 1 MXU matmul for all four
    gates, 2 full-tile EUP pushes (sigmoid/tanh), 1 MXU matmul for the output
    projection, 2 dense 128-lane stores (state scratch + output block).
    """
    H = hidden_dim
    t = pl.program_id(1)

    # First time step of this batch block: load the initial (h, c) slab.
    @pl.when(t == 0)
    def _():
        state_ref[...] = h0c0_ref[...]

    x_t = x_ref[0]                           # (bb, input_dim) f32
    h = state_ref[:, 0:H]                    # (bb, H) f32
    c = state_ref[:, H:2 * H]                # (bb, H) f32
    bb = x_t.shape[0]

    ones = jnp.ones((bb, 1), jnp.float32)

    # Fused gate matmul with bias folded in: [x_t | h | 1] @ [W_ih; W_hh; b]
    xh1 = jnp.concatenate([x_t, h, ones], axis=-1).astype(wg_ref.dtype)
    gates = jnp.dot(xh1, wg_ref[...], preferred_element_type=jnp.float32)

    # Full-tile activations, then slice i/f/g/o (PyTorch gate order).
    sg = jax.nn.sigmoid(gates)
    th = jnp.tanh(gates)
    i_g = sg[:, 0 * H:1 * H]
    f_g = sg[:, 1 * H:2 * H]
    g_g = th[:, 2 * H:3 * H]
    o_g = sg[:, 3 * H:4 * H]

    c_new = f_g * c + i_g * g_g
    h_new = o_g * jnp.tanh(c_new)

    # Linear head with bias folded in: [h' | 1] @ [W_out; b_out]
    h1 = jnp.concatenate([h_new, ones], axis=-1).astype(wout_ref.dtype)
    out = jnp.dot(h1, wout_ref[...], preferred_element_type=jnp.float32)

    # Lane-dense packed slab [h' | c' | out | pad]: one dense store each for
    # the carried state and the per-step output block (no masked stores).
    pad = slab_ref.shape[-1] - (2 * H + output_dim)
    pieces = [h_new, c_new, out]
    if pad:
        pieces.append(jnp.zeros((bb, pad), jnp.float32))
    packed = jnp.concatenate(pieces, axis=-1)
    state_ref[...] = packed
    slab_ref[0] = packed


def init_params(key, input_dim, output_dim, hidden_dim):
    """Deterministic synthetic parameters (PyTorch-style uniform init),
    already transposed to (in_features, out_features) layout."""
    ks = jax.random.split(key, 6)
    k_lstm = 1.0 / np.sqrt(hidden_dim)
    k_lin = 1.0 / np.sqrt(hidden_dim)
    u = lambda k, shape, s: jax.random.uniform(k, shape, jnp.float32, -s, s)
    return {
        "w_ih": u(ks[0], (input_dim, 4 * hidden_dim), k_lstm),
        "w_hh": u(ks[1], (hidden_dim, 4 * hidden_dim), k_lstm),
        "b_ih": u(ks[2], (4 * hidden_dim,), k_lstm),
        "b_hh": u(ks[3], (4 * hidden_dim,), k_lstm),
        "w_out": u(ks[4], (hidden_dim, output_dim), k_lin),
        "b_out": u(ks[5], (output_dim,), k_lin),
    }


def prepare_params(params, weights_dtype=jnp.bfloat16):
    """One-time parameter prep: fuse gate weights + summed bias row, fuse
    output weight + bias row, cast to the MXU-native weight dtype."""
    input_dim = params["w_ih"].shape[0]
    H = params["w_hh"].shape[0]
    out_dim = params["w_out"].shape[1]
    b_gate = (params["b_ih"] + params["b_hh"]).reshape(1, 4 * H)
    w_gate = jnp.concatenate([params["w_ih"], params["w_hh"], b_gate], axis=0)
    w_out = jnp.concatenate(
        [params["w_out"], params["b_out"].reshape(1, out_dim)], axis=0)
    return {
        "w_gate": w_gate.astype(weights_dtype),   # (input_dim + H + 1, 4H)
        "w_out": w_out.astype(weights_dtype),     # (H + 1, output_dim)
        "input_dim": input_dim,
        "hidden_dim": H,
        "output_dim": out_dim,
    }


def lstm_seq_forward(x, prepped, h0c0_slab, *, batch_block=None):
    """Fused LSTM-over-sequence + Linear head: one pallas_call for all steps.

    Returns the packed slab (seq, batch, SLAB) with [h_t | c_t | out_t | pad]
    per step; weights stay VMEM-resident, state is carried in VMEM scratch."""
    seq, batch, input_dim = x.shape
    H = prepped["hidden_dim"]
    out_dim = prepped["output_dim"]
    slab_w = h0c0_slab.shape[-1]

    if batch_block is None:
        # Split batch halves across cores (v7x megacore) when they tile cleanly.
        batch_block = batch // 2 if (batch % 16 == 0) else batch
    assert batch % batch_block == 0
    nb = batch // batch_block

    kernel = functools.partial(_lstm_seq_kernel,
                               hidden_dim=H, output_dim=out_dim)
    return pl.pallas_call(
        kernel,
        grid=(nb, seq),
        in_specs=[
            pl.BlockSpec((1, batch_block, input_dim), lambda b, t: (t, b, 0)),
            pl.BlockSpec((batch_block, slab_w), lambda b, t: (b, 0)),
            # Constant block index => weights DMA'd once, VMEM-resident.
            pl.BlockSpec(prepped["w_gate"].shape, lambda b, t: (0, 0)),
            pl.BlockSpec(prepped["w_out"].shape, lambda b, t: (0, 0)),
        ],
        out_specs=pl.BlockSpec((1, batch_block, slab_w), lambda b, t: (t, b, 0)),
        out_shape=jax.ShapeDtypeStruct((seq, batch, slab_w), jnp.float32),
        scratch_shapes=[pltpu.VMEM((batch_block, slab_w), jnp.float32)],
        compiler_params=pltpu.CompilerParams(
            dimension_semantics=("parallel", "arbitrary")),
    )(x, h0c0_slab, prepped["w_gate"], prepped["w_out"])


def decoder_step(x, prepped, hidden=None, cell=None, *, batch_block=None):
    """Mirrors DecoderStep.forward: returns (output, hidden, cell).
    output is (batch, output_dim) when seq_len == 1 (PyTorch squeeze(0)),
    else (seq, batch, output_dim)."""
    seq, batch, _ = x.shape
    H = prepped["hidden_dim"]
    out_dim = prepped["output_dim"]
    slab_w = _slab_width(H, out_dim)

    # nn.LSTM defaults missing state to zeros; handle hidden/cell independently.
    h0 = (jnp.zeros((batch, H), jnp.float32) if hidden is None
          else hidden[0].astype(jnp.float32))
    c0 = (jnp.zeros((batch, H), jnp.float32) if cell is None
          else cell[0].astype(jnp.float32))
    pieces = [h0, c0]
    if slab_w > 2 * H:
        pieces.append(jnp.zeros((batch, slab_w - 2 * H), jnp.float32))
    h0c0_slab = jnp.concatenate(pieces, axis=-1)

    slab = lstm_seq_forward(x.astype(jnp.float32), prepped, h0c0_slab,
                            batch_block=batch_block)

    out_all = slab[:, :, 2 * H:2 * H + out_dim]
    hN = slab[-1, :, 0:H][None]
    cN = slab[-1, :, H:2 * H][None]
    output = out_all[0] if seq == 1 else out_all   # output.squeeze(0)
    return output, hN, cN


def reference(x, params, hidden, cell):
    """Pure-JAX reference reproducing PyTorch LSTM + Linear semantics."""
    H = params["w_hh"].shape[0]
    h, c = hidden[0], cell[0]
    hs = []
    for t in range(x.shape[0]):
        gates = (x[t] @ params["w_ih"] + h @ params["w_hh"]
                 + params["b_ih"] + params["b_hh"])
        i = jax.nn.sigmoid(gates[:, :H])
        f = jax.nn.sigmoid(gates[:, H:2 * H])
        g = jnp.tanh(gates[:, 2 * H:3 * H])
        o = jax.nn.sigmoid(gates[:, 3 * H:4 * H])
        c = f * c + i * g
        h = o * jnp.tanh(c)
        hs.append(h)
    lstm_out = jnp.stack(hs, axis=0)
    if x.shape[0] == 1:
        lstm_out = lstm_out[0]               # output.squeeze(0)
    out = lstm_out @ params["w_out"] + params["b_out"]
    return out, h[None], c[None]


if __name__ == "__main__":
    # Small shapes implied by the forward: decoder step(s) over a tiny LSTM.
    seq_len, batch, input_dim, hidden_dim, output_dim = 1, 8, 16, 32, 24

    key = jax.random.PRNGKey(0)
    k_p, k_x, k_h, k_c, k_xs = jax.random.split(key, 5)
    params = init_params(k_p, input_dim, output_dim, hidden_dim)
    prepped_f32 = prepare_params(params, jnp.float32)   # tight-check path
    prepped_bf16 = prepare_params(params)               # bf16 MXU fast path

    x = jax.random.normal(k_x, (seq_len, batch, input_dim), jnp.float32)
    hidden = jax.random.normal(k_h, (1, batch, hidden_dim), jnp.float32)
    cell = jax.random.normal(k_c, (1, batch, hidden_dim), jnp.float32)

    # 1) Single step, explicit (hidden, cell), f32 weights: tight check.
    out, hN, cN = decoder_step(x, prepped_f32, hidden, cell)
    jax.block_until_ready((out, hN, cN))
    r_out, r_h, r_c = reference(x, params, hidden, cell)
    np.testing.assert_allclose(np.asarray(out), np.asarray(r_out), rtol=1e-5, atol=1e-5)
    np.testing.assert_allclose(np.asarray(hN), np.asarray(r_h), rtol=1e-5, atol=1e-5)
    np.testing.assert_allclose(np.asarray(cN), np.asarray(r_c), rtol=1e-5, atol=1e-5)

    # 2) hidden=None / cell=None branch (LSTM default zero state).
    out2, h2, c2 = decoder_step(x, prepped_f32)
    jax.block_until_ready((out2, h2, c2))
    z = jnp.zeros((1, batch, hidden_dim), jnp.float32)
    r2_out, r2_h, r2_c = reference(x, params, z, z)
    np.testing.assert_allclose(np.asarray(out2), np.asarray(r2_out), rtol=1e-5, atol=1e-5)
    np.testing.assert_allclose(np.asarray(h2), np.asarray(r2_h), rtol=1e-5, atol=1e-5)
    np.testing.assert_allclose(np.asarray(c2), np.asarray(r2_c), rtol=1e-5, atol=1e-5)

    # 2b) Mixed-None robustness (missing cell treated as zeros).
    out2b, _, _ = decoder_step(x, prepped_f32, hidden, None)
    jax.block_until_ready(out2b)
    r2b_out, _, _ = reference(x, params, hidden, z)
    np.testing.assert_allclose(np.asarray(out2b), np.asarray(r2b_out), rtol=1e-5, atol=1e-5)

    # 3) Fused multi-step decode: the whole 3-step sequence is ONE pallas_call
    #    (weights VMEM-resident, state carried in scratch across grid steps),
    #    replacing the previous Python for-loop of per-step pallas_calls.
    steps = 3
    x_seq = jax.random.normal(k_xs, (steps, batch, input_dim), jnp.float32)
    out3, h3, c3 = decoder_step(x_seq, prepped_f32, hidden, cell)
    jax.block_until_ready((out3, h3, c3))
    r3_out, r3_h, r3_c = reference(x_seq, params, hidden, cell)
    np.testing.assert_allclose(np.asarray(out3), np.asarray(r3_out), rtol=1e-5, atol=1e-5)
    np.testing.assert_allclose(np.asarray(h3), np.asarray(r3_h), rtol=1e-5, atol=1e-5)
    np.testing.assert_allclose(np.asarray(c3), np.asarray(r3_c), rtol=1e-5, atol=1e-5)

    # 4) bf16-weight fast path (default): same fused sequence, looser tolerance
    #    (expected bf16 weight precision loss; accumulation stays f32).
    out4, h4, c4 = decoder_step(x_seq, prepped_bf16, hidden, cell)
    jax.block_until_ready((out4, h4, c4))
    np.testing.assert_allclose(np.asarray(out4), np.asarray(r3_out), rtol=5e-2, atol=5e-2)
    np.testing.assert_allclose(np.asarray(h4), np.asarray(r3_h), rtol=5e-2, atol=5e-2)
    np.testing.assert_allclose(np.asarray(c4), np.asarray(r3_c), rtol=5e-2, atol=5e-2)

    print("KERNEL_OK")
</pallas_src>

<mosaic_0001>
module attributes {stable_mosaic.version = 11 : i64} {
  func.func @_lstm_seq_kernel(%arg0: i32, %arg1: i32, %arg2: memref<1x8x16xf32, #tpu.memory_space<vmem>>, %arg3: memref<8x128xf32, #tpu.memory_space<vmem>>, %arg4: memref<49x128xf32, #tpu.memory_space<vmem>>, %arg5: memref<33x24xf32, #tpu.memory_space<vmem>>, %arg6: memref<1x8x128xf32, #tpu.memory_space<vmem>>, %arg7: memref<8x128xf32, #tpu.memory_space<vmem>>) attributes {dimension_semantics = [#tpu.dimension_semantics<parallel>, #tpu.dimension_semantics<arbitrary>], iteration_bounds = array<i64: 1, 1>, scalar_prefetch = 0 : i64, scratch_operands = 1 : i64, tpu.core_type = #tpu.core_type<tc>, window_params = [{transform_indices = @transform_0, window_bounds = array<i64: 1, 8, 16>}, {transform_indices = @transform_1, window_bounds = array<i64: 8, 128>}, {pipeline_mode = #tpu.pipeline_mode<synchronous>, transform_indices = @transform_2, window_bounds = array<i64: 49, 128>}, {pipeline_mode = #tpu.pipeline_mode<synchronous>, transform_indices = @transform_3, window_bounds = array<i64: 33, 24>}, {transform_indices = @transform_4, window_bounds = array<i64: 1, 8, 128>}]} {
    %c0_i32 = arith.constant 0 : i32
    %0 = arith.cmpi eq, %arg1, %c0_i32 : i32
    %1 = arith.extui %0 : i1 to i32
    %c0_i32_0 = arith.constant 0 : i32
    %2 = arith.cmpi ne, %1, %c0_i32_0 : i32
    scf.if %2 {
      %c0_19 = arith.constant 0 : index
      %c0_20 = arith.constant 0 : index
      %35 = vector.load %arg3[%c0_19, %c0_20] : memref<8x128xf32, #tpu.memory_space<vmem>>, vector<8x128xf32>
      %c0_21 = arith.constant 0 : index
      %c0_22 = arith.constant 0 : index
      %36 = vector.load %arg7[%c0_21, %c0_22] : memref<8x128xf32, #tpu.memory_space<vmem>>, vector<8x128xf32>
      tpu.vector_store %arg7[%c0_21, %c0_22], %35 {strides = array<i32>} : memref<8x128xf32, #tpu.memory_space<vmem>>, vector<8x128xf32>,
    } else {
    }
    %c0 = arith.constant 0 : index
    %c0_1 = arith.constant 0 : index
    %c0_2 = arith.constant 0 : index
    %3 = vector.load %arg2[%c0, %c0_1, %c0_2] : memref<1x8x16xf32, #tpu.memory_space<vmem>>, vector<1x8x16xf32>
    %4 = vector.shape_cast %3 : vector<1x8x16xf32> to vector<8x16xf32>
    %c0_3 = arith.constant 0 : index
    %c0_4 = arith.constant 0 : index
    %5 = vector.load %arg7[%c0_3, %c0_4] : memref<8x128xf32, #tpu.memory_space<vmem>>, vector<8x32xf32>
    %c0_5 = arith.constant 0 : index
    %c32 = arith.constant 32 : index
    %6 = vector.load %arg7[%c0_5, %c32] : memref<8x128xf32, #tpu.memory_space<vmem>>, vector<8x32xf32>
    %cst = arith.constant 1.000000e+00 : f32
    %7 = vector.broadcast %cst : f32 to vector<8x1xf32>
    %8 = tpu.concatenate %4, %5, %7 in 1 : vector<8x16xf32>, vector<8x32xf32>, vector<8x1xf32> -> vector<8x49xf32>
    %c0_6 = arith.constant 0 : index
    %c0_7 = arith.constant 0 : index
    %9 = vector.load %arg4[%c0_6, %c0_7] : memref<49x128xf32, #tpu.memory_space<vmem>>, vector<49x128xf32>
    %cst_8 = arith.constant dense<0.000000e+00> : vector<8x128xf32>
    %10 = tpu.matmul %8, %9, %cst_8 {dimension_numbers = #tpu.dot_dimension_numbers<[1], [0], [0], [1], [0, 0, 1, 1], [], []>} : vector<8x49xf32>, vector<49x128xf32>, vector<8x128xf32> -> vector<8x128xf32>
    %11 = arith.negf %10 : vector<8x128xf32>
    %12 = math.exp %11 : vector<8x128xf32>
    %cst_9 = arith.constant 1.000000e+00 : f32
    %13 = vector.broadcast %cst_9 : f32 to vector<8x128xf32>
    %14 = arith.addf %13, %12 : vector<8x128xf32>
    %15 = arith.divf %13, %14 : vector<8x128xf32>
    %16 = math.tanh %10 : vector<8x128xf32>
    %17 = vector.extract_strided_slice %15 {offsets = [0, 0], sizes = [8, 32], strides = [1, 1]} : vector<8x128xf32> to vector<8x32xf32>
    %18 = vector.extract_strided_slice %15 {offsets = [0, 32], sizes = [8, 32], strides = [1, 1]} : vector<8x128xf32> to vector<8x32xf32>
    %19 = vector.extract_strided_slice %16 {offsets = [0, 64], sizes = [8, 32], strides = [1, 1]} : vector<8x128xf32> to vector<8x32xf32>
    %20 = vector.extract_strided_slice %15 {offsets = [0, 96], sizes = [8, 32], strides = [1, 1]} : vector<8x128xf32> to vector<8x32xf32>
    %21 = arith.mulf %18, %6 : vector<8x32xf32>
    %22 = arith.mulf %17, %19 : vector<8x32xf32>
    %23 = arith.addf %21, %22 : vector<8x32xf32>
    %24 = math.tanh %23 : vector<8x32xf32>
    %25 = arith.mulf %20, %24 : vector<8x32xf32>
    %26 = tpu.concatenate %25, %7 in 1 : vector<8x32xf32>, vector<8x1xf32> -> vector<8x33xf32>
    %c0_10 = arith.constant 0 : index
    %c0_11 = arith.constant 0 : index
    %27 = vector.load %arg5[%c0_10, %c0_11] : memref<33x24xf32, #tpu.memory_space<vmem>>, vector<33x24xf32>
    %cst_12 = arith.constant dense<0.000000e+00> : vector<8x24xf32>
    %28 = tpu.matmul %26, %27, %cst_12 {dimension_numbers = #tpu.dot_dimension_numbers<[1], [0], [0], [1], [0, 0, 1, 1], [], []>} : vector<8x33xf32>, vector<33x24xf32>, vector<8x24xf32> -> vector<8x24xf32>
    %cst_13 = arith.constant 0.000000e+00 : f32
    %29 = vector.broadcast %cst_13 : f32 to vector<8x40xf32>
    %30 = tpu.concatenate %25, %23, %28, %29 in 1 : vector<8x32xf32>, vector<8x32xf32>, vector<8x24xf32>, vector<8x40xf32> -> vector<8x128xf32>
    %c0_14 = arith.constant 0 : index
    %c0_15 = arith.constant 0 : index
    %31 = vector.load %arg7[%c0_14, %c0_15] : memref<8x128xf32, #tpu.memory_space<vmem>>, vector<8x128xf32>
    tpu.vector_store %arg7[%c0_14, %c0_15], %30 {strides = array<i32>} : memref<8x128xf32, #tpu.memory_space<vmem>>, vector<8x128xf32>,
    %c0_16 = arith.constant 0 : index
    %c0_17 = arith.constant 0 : index
    %c0_18 = arith.constant 0 : index
    %32 = vector.load %arg6[%c0_16, %c0_17, %c0_18] : memref<1x8x128xf32, #tpu.memory_space<vmem>>, vector<1x8x128xf32>
    %33 = vector.shape_cast %32 : vector<1x8x128xf32> to vector<8x128xf32>
    %34 = vector.shape_cast %30 : vector<8x128xf32> to vector<1x8x128xf32>
    tpu.vector_store %arg6[%c0_16, %c0_17, %c0_18], %34 {strides = array<i32>} : memref<1x8x128xf32, #tpu.memory_space<vmem>>, vector<1x8x128xf32>,
    return
  }
  func.func @transform_0(%arg0: i32, %arg1: i32) -> (i32, i32, i32) {
    %c0_i32 = arith.constant 0 : i32
    %c0_i32_0 = arith.constant 0 : i32
    return %arg1, %arg0, %c0_i32 : i32, i32, i32
  }
  func.func @transform_1(%arg0: i32, %arg1: i32) -> (i32, i32) {
    %c0_i32 = arith.constant 0 : i32
    %c0_i32_0 = arith.constant 0 : i32
    return %arg0, %c0_i32 : i32, i32
  }
  func.func @transform_2(%arg0: i32, %arg1: i32) -> (i32, i32) {
    %c0_i32 = arith.constant 0 : i32
    %c0_i32_0 = arith.constant 0 : i32
    %c0_i32_1 = arith.constant 0 : i32
    return %c0_i32, %c0_i32_0 : i32, i32
  }
  func.func @transform_3(%arg0: i32, %arg1: i32) -> (i32, i32) {
    %c0_i32 = arith.constant 0 : i32
    %c0_i32_0 = arith.constant 0 : i32
    %c0_i32_1 = arith.constant 0 : i32
    return %c0_i32, %c0_i32_0 : i32, i32
  }
  func.func @transform_4(%arg0: i32, %arg1: i32) -> (i32, i32, i32) {
    %c0_i32 = arith.constant 0 : i32
    %c0_i32_0 = arith.constant 0 : i32
    return %arg1, %arg0, %c0_i32 : i32, i32, i32
  }
}

</mosaic_0001>

<bundles_post_ra>
// kernel: tpu_custom_call.1
= control target key start
LH: loop header
LB: loop body
LE: loop exit
PB: predicated region body
PF: predicated region fallthrough
CT: control target
= control target key end

     0   :  { %9 = vsyncpa [#allocation4], 0  ;;  %s503_s0 = inlined_call_operand.vmem [shape: f32[1,8,16], index: 0, kind: input, shape index: {}]   ;;  %s504_s1 = inlined_call_operand.hbm [shape: f32[8,128], index: 1, kind: input, shape index: {}]   ;;  %s505_s2 = inlined_call_operand.vmem [shape: f32[49,128], index: 2, kind: input, shape index: {}]   ;;  %s506_s3 = inlined_call_operand.vmem [shape: f32[33,24], index: 3, kind: input, shape index: {}]   ;;  %s507_s4 = inlined_call_operand.hbm [shape: f32[1,8,128], index: 4, kind: output, shape index: {}]  }
   0x1   :  { %10 = vsyncpa [#allocation5], 0  ;;  %s397_s15 = smov [#allocation3]   ;;  %s349_s19 = scalar_lea.hbm %s504_s1, 128 }
   0x2   :  { %s19_s16 = sshll.u32 %s397_s15, 4  ;;  %p350_p0 = scmp.ne.s32.totalorder %s504_s1, %s349_s19  ;;  %s20_s16 = int_to_ptr.vmem [resolvable:$true] %s19_s16 }
   0x3   :  { %p353_p1 = scmp.lt.u32.totalorder %s349_s19, %s504_s1 }
   0x5   :  { %p355_p2 = pnand %p353_p1, %p350_p0 }
   0x7   :  { %358 = shalt.err (!%p355_p2)
}
   0x8   :  { %s359_s24 = scalar_lea.vmem %s20_s16, 128  ;;  %p364_p4 = scmp.lt.s32.totalorder %s20_s16, %s20_s16 }
   0x9   :  { %p360_p3 = scmp.ne.s32.totalorder %s20_s16, %s359_s24  ;;  %p365_p5 = scmp.lt.s32.totalorder %s359_s24, %s359_s24 }
   0xb   :  { %p366_p6 = por %p365_p5, %p364_p4 }
   0xd   :  { %p367_p7 = pnand %p366_p6, %p360_p3 }
   0xf   :  { %370 = shalt.err (!%p367_p7)
}
  0x10   :  { %22 = dma.hbm_to_vmem [thread:$0]  %s504_s1, 128, %s20_s16, [#allocation4]  }
  0x11   :  { %393 = dma.done.wait [#allocation4], 128  }
  0x12   :  { %394 = vsyncadd [#allocation4], 4294967168  ;;  %v398_v0 = vmov 0.0|0.0   ;;  %vm399_vm0 = vmmov 0   ;;  %v400_v1 = vmov 0.0   ;;  %v34_v2 = vld [vmem:[#allocation3] sm:$0xff] }
  0x13   :  { %318 = vmatprep.subr.bf16.mxu0 %v398_v0  ;;  %327 = vmatprep.subr.bf16.mxu1 %v398_v0  ;;  %v46_v3 = vld [vmem:[%s505_s2] sm:$0xff]  ;;  %v47_v4 = vld [vmem:[%s505_s2 + $0x8] sm:$0xff]  ;;  %s401_s1 = smov 16   ;;  %v48_v6 = vld [vmem:[%s505_s2 + $0x10] sm:$0xff]  ;;  %vm57_vm1 = vcmask 1040384   ;;  %vm42_vm2 = vcmask 130048  }
  0x14   :  { %302 = vmatprep.mubr.msk.f32.mxu0 %vm399_vm0, %v400_v1  ;;  %315 = vmatprep.mubr.msk.f32.mxu1 %vm399_vm0, %v400_v1  ;;  %v319_v5 = vpack.c.bf16 %v47_v4, %v46_v3  ;;  %v49_v7 = vld [vmem:[%s505_s2 + $0x18] sm:$0xff]  ;;  %v50_v9 = vld [vmem:[%s505_s2 + $0x20] sm:$0xff]  ;;  %v51_v10 = vld [vmem:[%s505_s2 + $0x28] sm:$0xff]  ;;  %vm44_vm3 = vcmask 392192   ;;  %vm53_vm4 = vcmask 400384   ;;  %s402_s17 = smov 64  }
  0x15   :  { %39 = vrot.lane.b32.xlu0 %v34_v2, %s401_s1  ;;  %v322_v8 = vpack.c.bf16 %v49_v7, %v48_v6  ;;  %v325_v11 = vpack.c.bf16 %v51_v10, %v50_v9  ;;  %v52_v12 = vld [vmem:[%s505_s2 + $0x30] sm:$0x1]  ;;  %v36_v13 = vld [vmem:[%s503_s0] sm:$0xff]  ;;  %s403_s0 = smov 32   ;;  %v162_v30 = vld [vmem:[%s506_s3 + $0x8] sm:$0xff]  ;;  %vm159_vm5 = vcmask 261120  }
  0x16   :  { %320 = vmatpush3.bf16.msra.mxu0 %v319_v5  ;;  %v161_v29 = vld [vmem:[%s506_s3] sm:$0xff]  ;;  %v163_v31 = vld [vmem:[%s506_s3 + $0x10] sm:$0xff]  ;;  %v164_v33 = vld [vmem:[%s506_s3 + $0x18] sm:$0xff]  ;;  %vm166_vm6 = vcmask 269312   ;;  %vm248_vm7 = vcmask 523264   ;;  %s404_s27 = smov [#allocation6]  }
  0x17   :  { %321 = vmatprep.subr.bf16.mxu0 %v398_v0  ;;  %v328_v32 = vpack.c.bf16 %v162_v30, %v161_v29  ;;  %v331_v34 = vpack.c.bf16 %v164_v33, %v163_v31  ;;  %v165_v36 = vld [vmem:[%s506_s3 + $0x20] sm:$0x1]  ;;  %s260_s28 = sshll.u32 %s404_s27, 4  ;;  %vm250_vm8 = vcmask 719872   ;;  %s261_s28 = int_to_ptr.vmem [resolvable:$true] %s260_s28 }
  0x18   :  { %s371_s3 = scalar_lea.vmem %s261_s28, 128  ;;  %p376_p9 = scmp.lt.s32.totalorder %s261_s28, %s261_s28 }
  0x19   :  { %329 = vmatpush3.bf16.msra.mxu1 %v328_v32  ;;  %p372_p8 = scmp.ne.s32.totalorder %s261_s28, %s371_s3  ;;  %p377_p10 = scmp.lt.s32.totalorder %s371_s3, %s371_s3 }
  0x1a   :  { %323 = vmatpush3.bf16.msra.mxu0 %v322_v8  ;;  %330 = vmatprep.subr.bf16.mxu1 %v398_v0 }
  0x1b   :  { %324 = vmatprep.subr.bf16.mxu0 %v398_v0  ;;  %p378_p11 = por %p377_p10, %p376_p9 }
  0x1d   :  { %332 = vmatpush3.bf16.msra.mxu1 %v331_v34  ;;  %p379_p12 = pnand %p378_p11, %p372_p8 }
  0x1e   :  { %326 = vmatpush3.bf16.msra.mxu0 %v325_v11  ;;  %313 = vmatprep.subr.mxu1 %v400_v1 }
  0x1f   :  { %300 = vmatprep.subr.mxu0 %v400_v1 }
  0x21   :  { %314 = vmatpush3.msk.msra.mxu1 %vm57_vm1, %v165_v36 }
  0x22   :  { %301 = vmatpush3.msk.msra.mxu0 %vm57_vm1, %v52_v12 }
  0x87   :  { %v40_v14 = vpop.permute.xlu0 %39 }
  0x88   :  { %v43_v15 = vsel %vm42_vm2, %v36_v13, %v40_v14 }
  0x89   :  { %v45_v16 = vsel %vm44_vm3, %v43_v15, 1.0 }
  0x8a   :  { %303 = vmatmul.mubr.msk.f32.vlgmr.msra.gmra.mrb[0].mxu0 %vm53_vm4, %v45_v16 }
 0x15d   :  { %v127_v17 = vpop.f32.mrb[0].mxu0 }
 0x15e   :  { %341 = vtanh.f32 %v127_v17  ;;  %v304_v18 = vpop.f32.mrb[1].mxu0  ;;  %v271_v20 = vmul.f32 -1.442695, %v127_v17 }
 0x160   :  { %343 = vpow2.f32 %v271_v20 }
 0x168   :  { %v342_v19 = vpop.eup %341 }
 0x169   :  { %140 = vrot.lane.b32.xlu0 %v342_v19, %s402_s17 }
 0x16a   :  { %v344_v21 = vpop.eup %343 }
 0x16b   :  { %v134_v22 = vadd.f32 1.0, %v344_v21 }
 0x16d   :  { %345 = vrcp.f32 %v134_v22 }
 0x177   :  { %v346_v23 = vpop.eup %345 }
 0x178   :  { %v138_v26 = vmul.f32 %v346_v23, %v34_v2 }
 0x1db   :  { %v141_v24 = vpop.permute.xlu0 %140 }
 0x1dc   :  { %v143_v25 = vmul.f32 %v346_v23, %v141_v24 }
 0x1de   :  { %145 = vrot.lane.b32.xlu1 %v143_v25, %s403_s0 }
 0x250   :  { %v146_v27 = vpop.permute.xlu1 %145 }
 0x251   :  { %v148_v28 = vadd.f32 %v146_v27, %v138_v26 }
 0x253   :  { %347 = vtanh.f32 %v148_v28 }
 0x25d   :  { %v348_v35 = vpop.eup %347 }
 0x25e   :  { %151 = vrot.lane.b32.xlu1 %v348_v35, %s402_s17 }
 0x2d0   :  { %v152_v37 = vpop.permute.xlu1 %151 }
 0x2d1   :  { %v154_v38 = vmul.f32 %v346_v23, %v152_v37 }
 0x2d3   :  { %156 = vrot.lane.b32.xlu0 %v154_v38, %s403_s0 }
 0x345   :  { %v157_v39 = vpop.permute.xlu0 %156 }
 0x346   :  { %v160_v40 = vsel %vm159_vm5, %v157_v39, 1.0  ;;  %v247_v41 = vsel %vm159_vm5, %v157_v39, %v148_v28 }
 0x347   :  { %316 = vmatmul.mubr.msk.f32.vlgmr.msra.gmra.mrb[0].mxu1 %vm166_vm6, %v160_v40 }
 0x41a   :  { %v239_v42 = vpop.f32.mrb[0].mxu1 }
 0x41b   :  { %244 = vrot.lane.b32.xlu1 %v239_v42, %s402_s17  ;;  %v317_v43 = vpop.f32.mrb[1].mxu1 }
 0x48d   :  { %v245_v44 = vpop.permute.xlu1 %244 }
 0x48e   :  { %v249_v45 = vsel %vm248_vm7, %v247_v41, %v245_v44 }
 0x48f   :  { %v251_v46 = vsel %vm250_vm8, %v249_v45, 0.0 }
 0x490   :  { %253 = vst [vmem:[#allocation6] sm:$0xff] %v251_v46 }
 0x491   :  { %382 = shalt.err (!%p379_p12)
}
 0x492   :  { %s383_s1 = scalar_lea.hbm %s507_s4, 128 }
 0x493   :  { %p384_p13 = scmp.ne.s32.totalorder %s507_s4, %s383_s1  ;;  %p387_p0 = scmp.lt.u32.totalorder %s383_s1, %s507_s4 }
 0x495   :  { %p389_p1 = pnand %p387_p0, %p384_p13 }
 0x497   :  { %392 = shalt.err (!%p389_p1)
}
 0x498   :  { %263 = dma.vmem_to_hbm [thread:$0]  %s261_s28, 128, %s507_s4, [#allocation5]  }
 0x499   :  { %395 = dma.done.wait [#allocation5], 128  }
 0x49a   :  { %396 = vsyncadd [#allocation5], 4294967168 }
 0x49b   :  { %267 = vsyncpa [#allocation4], 1 }
 0x49c   :  { %268 = vsyncpa [#allocation5], 1 }

</bundles_post_ra>
